<compile_context>
chip_gen: v6e
topology: v6e:2x2x1
jax: 0.10.0
libtpu: 0.0.40
codegen_flags: <defaults>
</compile_context>

<pallas_src>
import functools

import jax
import jax.numpy as jnp
from jax.experimental import pallas as pl
from jax.experimental.pallas import tpu as pltpu

_MIB = 1024 * 1024


# ---------------------------------------------------------------------------
# Kernels
# ---------------------------------------------------------------------------


def _se_fused_kernel(w1t_ref, w2t_ref, x_ref, o_ref, *, inv_hw, hw, mask_lanes):
    """Single fused pass: pool -> 1x1 conv -> LeakyReLU -> 1x1 conv -> sigmoid -> scale.

    w1t_ref: (C, Cmid)     first 1x1-conv weight, pre-transposed (resident)
    w2t_ref: (Cmid, C)     second 1x1-conv weight, pre-transposed (resident)
    x_ref  : (nb, C, HWp)  lane-dense block; HWp = ceil(HW / 128) * 128
    o_ref  : (nb, C, HWp)
    """
    x = x_ref[...]
    if mask_lanes:
        # The lane-dense block overhangs the un-padded array; overhang lanes
        # hold unspecified data, so mask them out of the pooled sum.
        lane = jax.lax.broadcasted_iota(jnp.int32, (1, 1, x_ref.shape[-1]), 2)
        x = jnp.where(lane < hw, x, jnp.zeros_like(x))

    # Global average pool over spatial (exact: masked lanes contribute 0).
    pooled = jnp.sum(x, axis=-1, dtype=jnp.float32) * inv_hw          # (nb, C)

    # Squeeze 1x1 conv + LeakyReLU (PyTorch default negative_slope = 0.01).
    h = jnp.dot(pooled, w1t_ref[...], preferred_element_type=jnp.float32)
    h = jnp.where(h > 0, h, 0.01 * h)
    # Excite 1x1 conv + exact sigmoid gate.
    y = jnp.dot(h, w2t_ref[...], preferred_element_type=jnp.float32)
    gate = jax.nn.sigmoid(y)                                          # (nb, C) f32

    # Broadcast the per-(n, c) gate over the spatial lanes.  The multiply runs
    # in x's dtype (bf16 stays bf16).  Re-reading x_ref keeps the pool sweep
    # and the scale sweep over VMEM as two explicit passes instead of one
    # multi-MiB vreg live range.
    scale = gate.astype(x_ref.dtype)[:, :, None]                      # (nb, C, 1)
    o_ref[...] = x_ref[...] * scale            # edge-block overhang writes drop


def _se_pool_kernel(x_ref, acc_ref, *, hw, mask_lanes):
    """Fallback pass 1: accumulate masked spatial sums into a (1, C, 1) block."""
    k = pl.program_id(1)
    t_hw = x_ref.shape[-1]
    x = x_ref[...]                                                    # (1, C, t_hw)
    if mask_lanes:
        lane = jax.lax.broadcasted_iota(jnp.int32, (1, 1, t_hw), 2) + k * t_hw
        x = jnp.where(lane < hw, x, jnp.zeros_like(x))
    part = jnp.sum(x, axis=-1, keepdims=True, dtype=jnp.float32)      # (1, C, 1)

    @pl.when(k == 0)
    def _():
        acc_ref[...] = part

    @pl.when(k > 0)
    def _():
        acc_ref[...] = acc_ref[...] + part


def _se_scale_kernel(gate_ref, x_ref, o_ref):
    """Fallback pass 2: o = x * gate, broadcast over the spatial chunk."""
    o_ref[...] = x_ref[...] * gate_ref[...].astype(o_ref.dtype)


# ---------------------------------------------------------------------------
# Wrapper
# ---------------------------------------------------------------------------


def _vmem_budget():
    """(target_block_bytes, vmem_cap_bytes) tuned per TPU generation."""
    try:
        vmem = int(pltpu.get_tpu_info().vmem_capacity_bytes)
    except Exception:                       # query unavailable -> conservative
        vmem = 64 * _MIB
    if vmem >= 128 * _MIB:                  # v5e / v6e
        return 8 * _MIB, 96 * _MIB
    return 4 * _MIB, 48 * _MIB              # v7x: stay well under 64 MiB physical


def se_module(x_nchw, w1, w2, *, donate_x=False,
              force_two_pass=False, two_pass_chunk_bytes=4 * _MIB):
    """SE forward.

    x_nchw: (N, C, H, W) activations (f32 or bf16; bf16 recommended on all
            generations -- the kernel is HBM-bound everywhere).
    w1:     (C // r, C)  first 1x1-conv weight  (squeezed PyTorch layout).
    w2:     (C, C // r)  second 1x1-conv weight (squeezed PyTorch layout).
    donate_x: alias x's HBM buffer to the output (only if the caller no
            longer needs x).
    """
    N, C, H, W = x_nchw.shape
    Cmid = w1.shape[0]
    HW = H * W
    dtype = x_nchw.dtype
    itemsize = jnp.dtype(dtype).itemsize

    x = x_nchw.reshape(N, C, HW)
    # Pre-transpose the tiny 1x1-conv weights once (wrapper-side, one-off).
    w1t = w1.T                                   # (C, Cmid)
    w2t = w2.T                                   # (Cmid, C)
    weight_bytes = int((w1.size + w2.size) * jnp.dtype(w1.dtype).itemsize)

    target_block_bytes, vmem_cap = _vmem_budget()
    slack = 4 * _MIB                             # Mosaic scratch / semaphores
    w_overhead = 2 * weight_bytes                # double-buffered resident weights

    HWp = ((HW + 127) // 128) * 128              # lane-dense block width (>= HW)
    per_image = C * HWp * itemsize

    single_pass = (not force_two_pass) and (
        4 * per_image + w_overhead + slack <= vmem_cap)

    if single_pass:
        # ---------------- single fused pass over x ----------------------
        nb = max(1, target_block_bytes // per_image)
        # Keep >= 4 grid steps when N >= 4 (two blocks per TensorCore on
        # v7x's megacore), >= 2 steps when N >= 2.
        if N >= 4:
            nb = min(nb, N // 4)
        elif N >= 2:
            nb = min(nb, N // 2)
        # Never exceed the VMEM budget: 2 double-buffers x (in + out) blocks.
        nb = min(nb, max(1, (vmem_cap - w_overhead - slack) // (4 * per_image)))
        nb = int(max(1, min(nb, N)))
        n_blocks = (N + nb - 1) // nb

        block_bytes = nb * per_image
        vmem_limit = int(min(vmem_cap,
                             max(32 * _MIB, 4 * block_bytes + w_overhead + slack)))
        mask_lanes = HWp != HW

        cost = pl.CostEstimate(
            flops=int(2 * N * C * HW + 4 * N * C * Cmid),
            transcendentals=int(N * C),
            bytes_accessed=int(2 * N * C * HW * itemsize + weight_bytes),
        )
        kernel = functools.partial(_se_fused_kernel, inv_hw=float(1.0 / HW),
                                   hw=HW, mask_lanes=mask_lanes)
        out = pl.pallas_call(
            kernel,
            out_shape=jax.ShapeDtypeStruct((N, C, HW), dtype),
            grid_spec=pltpu.PrefetchScalarGridSpec(
                num_scalar_prefetch=0,
                grid=(n_blocks,),
                in_specs=[
                    pl.BlockSpec((C, Cmid), lambda n: (0, 0)),         # w1.T
                    pl.BlockSpec((Cmid, C), lambda n: (0, 0)),         # w2.T
                    pl.BlockSpec((nb, C, HWp), lambda n: (n, 0, 0)),   # x
                ],
                out_specs=pl.BlockSpec((nb, C, HWp), lambda n: (n, 0, 0)),
            ),
            compiler_params=pltpu.CompilerParams(
                dimension_semantics=("parallel",),
                vmem_limit_bytes=vmem_limit,
            ),
            cost_estimate=cost,
            input_output_aliases=({2: 0} if donate_x else {}),
        )(w1t, w2t, x)
        return out.reshape(N, C, H, W)

    # ---------------- two-pass fallback (huge per-image slabs) -----------
    # Pass 1 (Pallas): masked pooled sums tiled over HW chunks.
    # Gate MLP (XLA): two (N, C)-sized matmuls + sigmoid -- negligible bytes,
    #                 so it is left to XLA on this rare path.
    # Pass 2 (Pallas): o = x * gate, re-reading x in HW chunks (one extra read
    #                  of x, but fits every generation's VMEM).
    t_hw = max(128, (int(two_pass_chunk_bytes) // (C * itemsize)) // 128 * 128)
    t_hw = min(t_hw, HWp)
    while 4 * C * t_hw * itemsize + slack > vmem_cap and t_hw > 128:
        t_hw -= 128
    n_hw = (HW + t_hw - 1) // t_hw
    mask_lanes = (HW % t_hw) != 0
    chunk_bytes = C * t_hw * itemsize
    vmem_limit = int(min(vmem_cap, max(32 * _MIB, 4 * chunk_bytes + slack)))

    pooled = pl.pallas_call(
        functools.partial(_se_pool_kernel, hw=HW, mask_lanes=mask_lanes),
        out_shape=jax.ShapeDtypeStruct((N, C, 1), jnp.float32),
        grid_spec=pltpu.PrefetchScalarGridSpec(
            num_scalar_prefetch=0,
            grid=(N, n_hw),
            in_specs=[pl.BlockSpec((1, C, t_hw), lambda n, k: (n, 0, k))],
            out_specs=pl.BlockSpec((1, C, 1), lambda n, k: (n, 0, 0)),
        ),
        compiler_params=pltpu.CompilerParams(
            dimension_semantics=("parallel", "arbitrary"),
            vmem_limit_bytes=vmem_limit,
        ),
        cost_estimate=pl.CostEstimate(
            flops=int(N * C * HW),
            transcendentals=0,
            bytes_accessed=int(N * C * HW * itemsize + N * C * 4),
        ),
    )(x)

    mean = pooled[:, :, 0] * (1.0 / HW)                                # (N, C)
    h = jnp.dot(mean, w1t, preferred_element_type=jnp.float32)
    h = jnp.where(h > 0, h, 0.01 * h)
    gate = jax.nn.sigmoid(
        jnp.dot(h, w2t, preferred_element_type=jnp.float32))[:, :, None]

    out = pl.pallas_call(
        _se_scale_kernel,
        out_shape=jax.ShapeDtypeStruct((N, C, HW), dtype),
        grid_spec=pltpu.PrefetchScalarGridSpec(
            num_scalar_prefetch=0,
            grid=(N, n_hw),
            in_specs=[
                pl.BlockSpec((1, C, 1), lambda n, k: (n, 0, 0)),       # gate
                pl.BlockSpec((1, C, t_hw), lambda n, k: (n, 0, k)),    # x
            ],
            out_specs=pl.BlockSpec((1, C, t_hw), lambda n, k: (n, 0, k)),
        ),
        compiler_params=pltpu.CompilerParams(
            dimension_semantics=("parallel", "parallel"),
            vmem_limit_bytes=vmem_limit,
        ),
        cost_estimate=pl.CostEstimate(
            flops=int(N * C * HW),
            transcendentals=0,
            bytes_accessed=int(2 * N * C * HW * itemsize + N * C * 4),
        ),
        input_output_aliases=({1: 0} if donate_x else {}),
    )(gate, x)
    return out.reshape(N, C, H, W)


# ---------------------------------------------------------------------------
# Reference & test
# ---------------------------------------------------------------------------


def _reference(x, w1, w2):
    mean = jnp.mean(x, axis=(2, 3), keepdims=True)                     # (N, C, 1, 1)
    h = jnp.einsum('mc,nchw->nmhw', w1, mean)                          # (N, Cmid, 1, 1)
    h = jnp.where(h > 0, h, 0.01 * h)
    y = jnp.einsum('cm,nmhw->nchw', w2, h)                             # (N, C, 1, 1)
    return x * jax.nn.sigmoid(y)


if __name__ == "__main__":
    key = jax.random.PRNGKey(0)

    def make_case(case_key, N, C, H, W, r):
        Cmid = max(1, C // r)
        kx, k1, k2 = jax.random.split(case_key, 3)
        x = jax.random.normal(kx, (N, C, H, W), dtype=jnp.float32)
        b1 = 1.0 / (C ** 0.5)
        b2 = 1.0 / (Cmid ** 0.5)
        w1 = jax.random.uniform(k1, (Cmid, C), jnp.float32, -b1, b1)
        w2 = jax.random.uniform(k2, (C, Cmid), jnp.float32, -b2, b2)
        return x, w1, w2

    cases = [
        # 1) HW multiple of 128, N >= 4 (no masking, >=4 grid steps).
        dict(N=4, C=32, H=16, W=16, r=16, kw={}),
        # 2) 7x7-style map: HW=49 < 128 (lane masking), odd batch.
        dict(N=3, C=32, H=7, W=7, r=16, kw={}),
        # 3) batch overhang (N % nb != 0) + lane masking (HW=36).
        dict(N=11, C=32, H=6, W=6, r=16, kw={}),
        # 4) forced two-pass fallback with a multi-chunk spatial reduction.
        dict(N=2, C=32, H=12, W=12, r=16,
             kw=dict(force_two_pass=True, two_pass_chunk_bytes=32 * 128 * 4)),
    ]

    for case_key, case in zip(jax.random.split(key, len(cases)), cases):
        x, w1, w2 = make_case(case_key, case["N"], case["C"], case["H"],
                              case["W"], case["r"])
        out = jax.block_until_ready(se_module(x, w1, w2, **case["kw"]))
        ref = _reference(x, w1, w2)
        assert out.shape == x.shape
        assert jnp.allclose(out, ref, atol=1e-5, rtol=1e-5), \
            f"mismatch vs reference for case {case}"

    print("KERNEL_OK")
</pallas_src>

<mosaic_0001>
module attributes {stable_mosaic.version = 11 : i64} {
  func.func @_se_fused_kernel(%arg0: i32, %arg1: memref<32x2xf32, #tpu.memory_space<vmem>>, %arg2: memref<2x32xf32, #tpu.memory_space<vmem>>, %arg3: memref<1x32x256xf32, #tpu.memory_space<vmem>>, %arg4: memref<1x32x256xf32, #tpu.memory_space<vmem>>) attributes {dimension_semantics = [#tpu.dimension_semantics<parallel>], iteration_bounds = array<i64: 4>, scalar_prefetch = 0 : i64, scratch_operands = 0 : i64, tpu.core_type = #tpu.core_type<tc>, window_params = [{pipeline_mode = #tpu.pipeline_mode<synchronous>, transform_indices = @transform_0, window_bounds = array<i64: 32, 2>}, {pipeline_mode = #tpu.pipeline_mode<synchronous>, transform_indices = @transform_1, window_bounds = array<i64: 2, 32>}, {transform_indices = @transform_2, window_bounds = array<i64: 1, 32, 256>}, {transform_indices = @transform_3, window_bounds = array<i64: 1, 32, 256>}]} {
    %c0 = arith.constant 0 : index
    %c0_0 = arith.constant 0 : index
    %c0_1 = arith.constant 0 : index
    %0 = vector.load %arg3[%c0, %c0_0, %c0_1] : memref<1x32x256xf32, #tpu.memory_space<vmem>>, vector<1x32x256xf32>
    %cst = arith.constant dense<0.000000e+00> : vector<1x32xf32>
    %1 = vector.multi_reduction <add>, %0, %cst [2] : vector<1x32x256xf32> to vector<1x32xf32>
    %cst_2 = arith.constant 3.906250e-03 : f32
    %2 = vector.broadcast %cst_2 : f32 to vector<1x32xf32>
    %3 = arith.mulf %1, %2 : vector<1x32xf32>
    %c0_3 = arith.constant 0 : index
    %c0_4 = arith.constant 0 : index
    %4 = vector.load %arg1[%c0_3, %c0_4] : memref<32x2xf32, #tpu.memory_space<vmem>>, vector<32x2xf32>
    %cst_5 = arith.constant dense<0.000000e+00> : vector<1x2xf32>
    %5 = tpu.matmul %3, %4, %cst_5 {dimension_numbers = #tpu.dot_dimension_numbers<[1], [0], [0], [1], [0, 0, 1, 1], [], []>} : vector<1x32xf32>, vector<32x2xf32>, vector<1x2xf32> -> vector<1x2xf32>
    %cst_6 = arith.constant 0.000000e+00 : f32
    %6 = vector.broadcast %cst_6 : f32 to vector<1x2xf32>
    %7 = arith.cmpf ogt, %5, %6 : vector<1x2xf32>
    %cst_7 = arith.constant 0.00999999977 : f32
    %8 = vector.broadcast %cst_7 : f32 to vector<1x2xf32>
    %9 = arith.mulf %8, %5 : vector<1x2xf32>
    %10 = arith.select %7, %5, %9 : vector<1x2xi1>, vector<1x2xf32>
    %c0_8 = arith.constant 0 : index
    %c0_9 = arith.constant 0 : index
    %11 = vector.load %arg2[%c0_8, %c0_9] : memref<2x32xf32, #tpu.memory_space<vmem>>, vector<2x32xf32>
    %cst_10 = arith.constant dense<0.000000e+00> : vector<1x32xf32>
    %12 = tpu.matmul %10, %11, %cst_10 {dimension_numbers = #tpu.dot_dimension_numbers<[1], [0], [0], [1], [0, 0, 1, 1], [], []>} : vector<1x2xf32>, vector<2x32xf32>, vector<1x32xf32> -> vector<1x32xf32>
    %13 = arith.negf %12 : vector<1x32xf32>
    %14 = math.exp %13 : vector<1x32xf32>
    %cst_11 = arith.constant 1.000000e+00 : f32
    %15 = vector.broadcast %cst_11 : f32 to vector<1x32xf32>
    %16 = arith.addf %15, %14 : vector<1x32xf32>
    %17 = arith.divf %15, %16 : vector<1x32xf32>
    %18 = vector.shape_cast %17 : vector<1x32xf32> to vector<1x32x1xf32>
    %c0_12 = arith.constant 0 : index
    %c0_13 = arith.constant 0 : index
    %c0_14 = arith.constant 0 : index
    %19 = vector.load %arg3[%c0_12, %c0_13, %c0_14] : memref<1x32x256xf32, #tpu.memory_space<vmem>>, vector<1x32x256xf32>
    %20 = vector.broadcast %18 : vector<1x32x1xf32> to vector<1x32x256xf32>
    %21 = arith.mulf %19, %20 : vector<1x32x256xf32>
    %c0_15 = arith.constant 0 : index
    %c0_16 = arith.constant 0 : index
    %c0_17 = arith.constant 0 : index
    %22 = vector.load %arg4[%c0_15, %c0_16, %c0_17] : memref<1x32x256xf32, #tpu.memory_space<vmem>>, vector<1x32x256xf32>
    tpu.vector_store %arg4[%c0_15, %c0_16, %c0_17], %21 {strides = array<i32>} : memref<1x32x256xf32, #tpu.memory_space<vmem>>, vector<1x32x256xf32>,
    return
  }
  func.func @transform_0(%arg0: i32) -> (i32, i32) {
    %c0_i32 = arith.constant 0 : i32
    %c0_i32_0 = arith.constant 0 : i32
    %c0_i32_1 = arith.constant 0 : i32
    return %c0_i32, %c0_i32_0 : i32, i32
  }
  func.func @transform_1(%arg0: i32) -> (i32, i32) {
    %c0_i32 = arith.constant 0 : i32
    %c0_i32_0 = arith.constant 0 : i32
    %c0_i32_1 = arith.constant 0 : i32
    return %c0_i32, %c0_i32_0 : i32, i32
  }
  func.func @transform_2(%arg0: i32) -> (i32, i32, i32) {
    %c0_i32 = arith.constant 0 : i32
    %c0_i32_0 = arith.constant 0 : i32
    %c0_i32_1 = arith.constant 0 : i32
    return %arg0, %c0_i32, %c0_i32_0 : i32, i32, i32
  }
  func.func @transform_3(%arg0: i32) -> (i32, i32, i32) {
    %c0_i32 = arith.constant 0 : i32
    %c0_i32_0 = arith.constant 0 : i32
    %c0_i32_1 = arith.constant 0 : i32
    return %arg0, %c0_i32, %c0_i32_0 : i32, i32, i32
  }
}

</mosaic_0001>

<bundles_post_ra>
// kernel: tpu_custom_call.1
= control target key start
LH: loop header
LB: loop body
LE: loop exit
PB: predicated region body
PF: predicated region fallthrough
CT: control target
= control target key end

     0   :  { %8 = vsyncpa [#allocation3], 0  ;;  %s955_s0 = inlined_call_operand.vmem [shape: f32[32,2], index: 0, kind: input, shape index: {}]   ;;  %s956_s1 = inlined_call_operand.vmem [shape: f32[2,32], index: 1, kind: input, shape index: {}]   ;;  %s957_s2 = inlined_call_operand.hbm [shape: f32[4,32,256], index: 2, kind: input, shape index: {}]   ;;  %s958_s3 = inlined_call_operand.hbm [shape: f32[4,32,256], index: 3, kind: output, shape index: {}]  }
   0x1   :  { %10 = vsyncpa [#allocation3 + $0x1], 0 }
   0x2   :  { %11 = vsyncpa [#allocation4], 0 }
   0x3   :  { %13 = vsyncpa [#allocation4 + $0x1], 0  ;;  %s752_s12 = smov 0   ;;  %s754_s13 = smov 0  }
   0x4   :  { %s756_s14 = smov 0   ;;  %s758_s15 = smov 0  }
   0x5 LB: > { %s773_s16 = sadd.s32 4294967295, %s722_s15   ;;  %s531_s17 = sadd.s32 4294967294, %s722_s15   ;;  %s722_s15 = sphi %s758_s15, %s972_s15   ;;  %s718_s14 = sphi %s756_s14, %s971_s14   ;;  %s714_s13 = sphi %s754_s13, %s970_s13   ;;  %s710_s12 = sphi %s752_s12, %s969_s12  }
   0x6   : > { %s777_s18 = sadd.s32 1, %s722_s15   ;;  %s68_s19 = sadd.s32 1, %s718_s14 }
   0x7   : > { %s65_s20 = ssub.s32 %s722_s15, %s777_s18  ;;  %p75_p0 = scmp.ne.s32.totalorder %s718_s14, %s714_s13 }
   0x8   : > { %p66_p1 = scmp.eq.s32.totalorder %s65_s20, 0  ;;  %p76_p2 = scmp.eq.s32.totalorder %s722_s15, 0 }
   0x9   : > { %p81_p3 = scmp.ne.s32.totalorder %s714_s13, %s710_s12  ;;  %p82_p4 = scmp.eq.s32.totalorder %s773_s16, 0 }
   0xa   : > { %s789_s21 = scalar_select %p66_p1, %s718_s14, %s68_s19  }
   0xb   : > { %p791_p5 = por %p76_p2, %p75_p0  ;;  %p795_p6 = por %p82_p4, %p81_p3 }
   0xc   : > { %p105_p7 = scmp.eq.s32.totalorder %s773_s16, 3  ;;  %p111_p8 = scmp.eq.s32.totalorder %s531_s17, 3 }
   0xd   : > { %s962_s23 = scalar_select %p795_p6, 1, 0 }
   0xe   : > { %p586_p9 = scmp.lt.s32.totalorder %s722_s15, 4  ;;  %p801_p10 = por %p105_p7, %p75_p0 }
   0xf   : > { %p805_p11 = por %p111_p8, %p81_p3  ;;  %s137_s26 = sand.u32 1, %s718_s14  }
  0x10   : > { %s963_s24 = scalar_select %p801_p10, 1, 0 }
  0x11   : > { %s964_s25 = scalar_select %p805_p11, 1, 0 }
  0x12   : > { %s549_s27 = sshll.u32 %s722_s15, 10  ;;  %s534_s28 = sshll.u32 %s137_s26, 6 }
  0x13   : > { %s814_s4 = scalar_lea.hbm %s957_s2, %s549_s27  ;;  %s141_s5 = scalar_lea.vmem [#allocation2], %s534_s28 }
  0x14   : > { %s148_s6 = sshll.u32 %s141_s5, 4  ;;  %p818_p12 = pnand %p586_p9, %p791_p5  ;;  %s822_s6 = int_to_ptr.vmem [resolvable:$true] %s148_s6 }
  0x15   : > { %s824_s8 = scalar_lea.sflag [#allocation3], %s137_s26  ;;  %s630_s9 = scalar_lea.hbm %s814_s4, 1024 }
  0x16   : > { %p631_p13 = scmp.ne.s32.totalorder %s814_s4, %s630_s9  ;;  %p632_p0 = pneg %p818_p12 }
  0x17   : > { %s635_s17 = scalar_lea.hbm %s957_s2, 4096  ;;  %p636_p3 = scmp.lt.s32.totalorder %s814_s4, %s957_s2 }
  0x18   : > { %p633_p1 = pnand %p632_p0, %p631_p13  ;;  %p637_p4 = scmp.lt.s32.totalorder %s635_s17, %s630_s9 }
  0x1a   : > { %p634_p2 = pneg %p633_p1  ;;  %p638_p5 = por %p637_p4, %p636_p3 }
  0x1c   : > { %p639_p7 = pnand %p638_p5, %p634_p2 }
  0x1e   : > { %642 = shalt.err (!%p639_p7)
}
  0x1f   : > { %s643_s22 = scalar_lea.vmem %s822_s6, 1024  ;;  %s724_s26 = smov [#allocation2]  }
  0x20   : > { %p644_p8 = scmp.ne.s32.totalorder %s822_s6, %s643_s22  ;;  %s648_s27 = sshll.u32 %s724_s26, 4  ;;  %s649_s27 = int_to_ptr.vmem [resolvable:$false] %s648_s27 }
  0x21   : > { %s650_s28 = scalar_lea.vmem %s649_s27, 2048  ;;  %p651_p1 = scmp.lt.s32.totalorder %s822_s6, %s649_s27 }
  0x22   : > { %p646_p9 = pnand %p644_p8, %p632_p0  ;;  %p652_p11 = scmp.lt.s32.totalorder %s650_s28, %s643_s22 }
  0x24   : > { %p647_p13 = pneg %p646_p9  ;;  %p653_p10 = por %p652_p11, %p651_p1 }
  0x26   : > { %p654_p6 = pnand %p653_p10, %p647_p13 }
  0x28   : > { %657 = shalt.err (!%p654_p6)
}
  0x29   : > { %s725_s29 = smov 256   ;;  %s726_s30 = smov 16  }
  0x2a   : > { %581 = dma.hbm_to_vmem [thread:$0]  (!%p818_p12), %s814_s4, 1024, %s822_s6, %s824_s8, %s725_s29, %s725_s29, %s726_s30  }
  0x2b   : > { %p537_p0 = scmp.ge.s32.totalorder %s722_s15, 1  ;;  %p156_p2 = scmp.lt.s32.totalorder %s722_s15, 5 }
  0x2d   : > { %p157_p3 = pnand %p537_p0, %p156_p2 }
  0x2e   : > { %s848_s5 = sand.u32 (!%p157_p3), 1, %s714_s13   ;;  %p966_p6 = scmp.ne.s32.totalorder (!%p157_p3), %s962_s23, 0 }
  0x2f   : > { %160 = sbr.rel (%p157_p3) target bundleno = 767 (0x2ff), region = 32  ;;  %s538_s9 = sshll.u32 (!%p157_p3), %s848_s5, 6 }
  0x30   : > { %s163_s10 = scalar_lea.sflag (!%p157_p3), [#allocation3], %s848_s5  ;;  %s166_s11 = scalar_lea.vmem (!%p157_p3), [#allocation2], %s538_s9 }
  0x34   : > { %701 = dma.done.wait (%p966_p6), %s163_s10, 1024  }
  0x35   : > { %703 = vsyncadd (%p966_p6), %s163_s10, 4294966272  ;;  %v858_v0 = vld [vmem:[%s166_s11] sm:$0xff]  ;;  %v860_v1 = vld [vmem:[%s166_s11 + $0x8] sm:$0xff]  ;;  %v727_v12 = vmov 0.0   ;;  %vm728_vm0 = vmmov 0   ;;  %v221_v17 = vlaneseq  ;;  %vm232_vm1 = vcmask 130112  }
  0x36   : > { %v862_v2 = vld [vmem:[%s166_s11 + $0x20] sm:$0xff]  ;;  %v197_v3 = vadd.f32 %v860_v1, %v858_v0  ;;  %v866_v4 = vld [vmem:[%s166_s11 + $0x28] sm:$0xff]  ;;  %v868_v5 = vld [vmem:[%s166_s11 + $0x10] sm:$0xff]  ;;  %558 = vmatprep.subr.mxu0 %v727_v12  ;;  %569 = vmatprep.subr.mxu1 %v727_v12  ;;  %vm239_vm2 = vcmask 195712   ;;  %vm246_vm3 = vcmask 261312   ;;  %vm248_vm4 = vcmask 261120  }
  0x37   : > { %v870_v6 = vld [vmem:[%s166_s11 + $0x18] sm:$0xff]  ;;  %v203_v7 = vadd.f32 %v866_v4, %v862_v2  ;;  %v874_v8 = vld [vmem:[%s166_s11 + $0x30] sm:$0xff]  ;;  %v214_v15 = vld [vmem:[%s955_s0 + $0x8] sm:$0xff]  ;;  %566 = vmatprep.mubr.msk.f32.mxu0 %vm728_vm0, %v727_v12  ;;  %571 = vmatprep.mubr.msk.f32.mxu1 %vm728_vm0, %v727_v12  ;;  %v222_v18 = vand.u32 127, %v221_v17  ;;  %v224_v19 = vshrl.u32 %v221_v17, 7  ;;  %vm329_vm5 = vcmask 1041408  }
  0x38   : > { %v876_v9 = vld [vmem:[%s166_s11 + $0x38] sm:$0xff]  ;;  %198 = vadd.xlane.f32.xlu0 %v197_v3  ;;  %v200_v10 = vadd.f32 %v870_v6, %v868_v5  ;;  %v215_v14 = vld [vmem:[%s955_s0 + $0x10] sm:$0xff]  ;;  %v213_v16 = vld [vmem:[%s955_s0] sm:$0xff]  ;;  %vm325_vm7 = vcmask 15360   ;;  %s188_s27 = scalar_lea.vmem [#allocation5], %s538_s9  ;;  %s550_s29 = sshll.u32 %s773_s16, 10 }
  0x39   : > { %204 = vadd.xlane.f32.xlu1 %v203_v7  ;;  %v206_v11 = vadd.f32 %v876_v9, %v874_v8  ;;  %v216_v13 = vld [vmem:[%s955_s0 + $0x18] sm:$0xff]  ;;  %v227_v20 = vadd.s32 4294967288, %v222_v18  ;;  %v234_v22 = vadd.s32 4294967280, %v222_v18  ;;  %v241_v23 = vadd.s32 4294967272, %v222_v18  ;;  %v324_v42 = vld [vmem:[%s956_s1] sm:$0x3]  ;;  %s911_s10 = scalar_lea.hbm %s958_s3, %s550_s29 }
  0x3a   : > { %559 = vmatpush3.msra.mxu0 %v216_v13  ;;  %v225_v25 = vsub.s32 %v222_v18, %v224_v19  ;;  %570 = vmatpush3.msk.msra.mxu1 %vm329_vm5, %v324_v42  ;;  %v411_v52 = vsub.s32 0, %v224_v19  ;;  %s458_s28 = sshll.u32 %s188_s27, 4  ;;  %s445_s16 = scalar_lea.sflag [#allocation4], %s848_s5  ;;  %s906_s28 = int_to_ptr.vmem [resolvable:$true] %s458_s28 }
  0x3b   : > { %560 = vmatprep.subr.mxu0 %v727_v12  ;;  %v230_v27 = vsub.s32 %v227_v20, %v224_v19  ;;  %v237_v28 = vsub.s32 %v234_v22, %v224_v19  ;;  %v244_v31 = vsub.s32 %v241_v23, %v224_v19  ;;  %s658_s11 = scalar_lea.vmem %s906_s28, 1024  ;;  %p967_p11 = scmp.ne.s32.totalorder %s963_s24, 0 }
  0x3c   : > { %201 = vadd.xlane.f32.xlu0 %v200_v10  ;;  %561 = vmatpush3.msra.mxu0 %v215_v14  ;;  %p659_p10 = scmp.ne.s32.totalorder %s906_s28, %s658_s11  ;;  %s729_s23 = smov [#allocation5]  }
  0x3d   : > { %207 = vadd.xlane.f32.xlu1 %v206_v11  ;;  %562 = vmatprep.subr.mxu0 %v727_v12  ;;  %s662_s4 = sshll.u32 %s729_s23, 4  ;;  %s663_s4 = int_to_ptr.vmem [resolvable:$false] %s662_s4 }
  0x3e   : > { %563 = vmatpush3.msra.mxu0 %v214_v15  ;;  %p660_p12 = pnand %p659_p10, %p967_p11  ;;  %s664_s6 = scalar_lea.vmem %s663_s4, 2048 }
  0x3f   : > { %564 = vmatprep.subr.mxu0 %v727_v12  ;;  %p665_p5 = scmp.lt.s32.totalorder %s906_s28, %s663_s4  ;;  %p666_p7 = scmp.lt.s32.totalorder %s664_s6, %s658_s11 }
  0x40   : > { %565 = vmatpush3.msra.mxu0 %v213_v16  ;;  %p661_p4 = pneg %p660_p12 }
  0x41   : > { %p667_p8 = por %p666_p7, %p665_p5 }
  0x43   : > { %p668_p9 = pnand %p667_p8, %p661_p4 }
  0xc1   : > { %v199_v21 = vpop.xlane.xlu0 %198 }
  0xc2   : > { %v205_v24 = vpop.xlane.xlu1 %204  ;;  %v209_v26 = vmul.f32 0.00390625, %v199_v21 }
  0xc3   : > { %v211_v29 = vmul.f32 0.00390625, %v205_v24 }
  0xc4   : > { %v226_v35 = vrot.slane %v209_v26, %v225_v25 }
  0xc5   : > { %v202_v30 = vpop.xlane.xlu0 %201  ;;  %v238_v37 = vrot.slane %v211_v29, %v237_v28 }
  0xc6   : > { %v210_v32 = vmul.f32 0.00390625, %v202_v30  ;;  %v208_v33 = vpop.xlane.xlu1 %207 }
  0xc7   : > { %v212_v34 = vmul.f32 0.00390625, %v208_v33 }
  0xc8   : > { %v231_v36 = vrot.slane %v210_v32, %v230_v27 }
  0xc9   : > { %v245_v38 = vrot.slane %v212_v34, %v244_v31 }
  0xca   : > { %v233_v39 = vsel %vm232_vm1, %v231_v36, %v226_v35 }
  0xcb   : > { %v240_v40 = vsel %vm239_vm2, %v238_v37, %v233_v39 }
  0xcc   : > { %v247_v41 = vsel %vm246_vm3, %v245_v38, %v240_v40 }
  0xcd   : > { %567 = vmatmul.mubr.msk.f32.vlgmr.msra.gmra.mxu0 %vm248_vm4, %v247_v41 }
 0x18d   : > { %v317_v43 = vpop.f32.mrf.mxu0 }
 0x18e   : > { %vm321_vm6 = vcmp.gt.f32.partialorder %v317_v43, 0.0  ;;  %v322_v44 = vmul.f32 0.01, %v317_v43 }
 0x18f   : > { %v568_v45 = vpop.f32.mrf.mxu0 }
 0x190   : > { %v323_v46 = vsel %vm321_vm6, %v317_v43, %v322_v44 }
 0x191   : > { %572 = vmatmul.mubr.msk.f32.vlgmr.msra.gmra.mxu1 %vm325_vm7, %v323_v46 }
 0x251   : > { %v399_v47 = vpop.f32.mrf.mxu1 }
 0x252   : > { %v543_v48 = vmul.f32 -1.442695, %v399_v47 }
 0x253   : > { %v573_v49 = vpop.f32.mrf.mxu1 }
 0x254   : > { %626 = vpow2.f32 %v543_v48 }
 0x261   : > { %v627_v50 = vpop.eup %626 }
 0x262   : > { %v406_v51 = vadd.f32 1.0, %v627_v50 }
 0x264   : > { %628 = vrcp.f32 %v406_v51 }
 0x271   : > { %v629_v53 = vpop.eup %628 }
 0x272   : > { %v412_v54 = vrot.slane %v629_v53, %v411_v52 }
 0x274   : > { %418 = vbcast.lane.b32.xlu1 %v412_v54, 264  ;;  %414 = vbcast.lane.b32.xlu0 %v412_v54, 256 }
 0x278   : > { %422 = vbcast.lane.b32.xlu1 %v412_v54, 272 }
 0x27c   : > { %426 = vbcast.lane.b32.xlu1 %v412_v54, 280 }
 0x2e6   : > { %v419_v55 = vpop.permute.xlu1 %418  ;;  %v415_v56 = vpop.permute.xlu0 %414 }
 0x2e7   : > { %v430_v57 = vmul.f32 %v419_v55, %v868_v5  ;;  %v431_v58 = vmul.f32 %v419_v55, %v870_v6  ;;  %v428_v59 = vmul.f32 %v415_v56, %v858_v0  ;;  %v429_v60 = vmul.f32 %v415_v56, %v860_v1 }
 0x2e9   : > { %438 = vst [vmem:[%s188_s27 + $0x10] sm:$0xff] %v430_v57  ;;  %439 = vst [vmem:[%s188_s27 + $0x18] sm:$0xff] %v431_v58 }
 0x2ea   : > { %436 = vst [vmem:[%s188_s27] sm:$0xff] %v428_v59  ;;  %437 = vst [vmem:[%s188_s27 + $0x8] sm:$0xff] %v429_v60  ;;  %v423_v61 = vpop.permute.xlu1 %422 }
 0x2eb   : > { %v432_v62 = vmul.f32 %v423_v61, %v862_v2  ;;  %v433_v63 = vmul.f32 %v423_v61, %v866_v4 }
 0x2ed   : > { %440 = vst [vmem:[%s188_s27 + $0x20] sm:$0xff] %v432_v62  ;;  %441 = vst [vmem:[%s188_s27 + $0x28] sm:$0xff] %v433_v63 }
 0x2ee   : > { %v427_v0 = vpop.permute.xlu1 %426 }
 0x2ef   : > { %v434_v1 = vmul.f32 %v427_v0, %v874_v8  ;;  %v435_v2 = vmul.f32 %v427_v0, %v876_v9 }
 0x2f1   : > { %442 = vst [vmem:[%s188_s27 + $0x30] sm:$0xff] %v434_v1  ;;  %443 = vst [vmem:[%s188_s27 + $0x38] sm:$0xff] %v435_v2 }
 0x2f2   : > { %671 = shalt.err (!%p668_p9)
}
 0x2f3   : > { %s672_s7 = scalar_lea.hbm %s911_s10, 1024  ;;  %s676_s19 = scalar_lea.hbm %s958_s3, 4096 }
 0x2f4   : > { %p673_p13 = scmp.ne.s32.totalorder %s911_s10, %s672_s7  ;;  %p677_p2 = scmp.lt.s32.totalorder %s911_s10, %s958_s3 }
 0x2f5   : > { %p678_p3 = scmp.lt.s32.totalorder %s676_s19, %s672_s7 }
 0x2f6   : > { %p674_p1 = pnand %p673_p13, %p967_p11 }
 0x2f7   : > { %p679_p6 = por %p678_p3, %p677_p2 }
 0x2f8   : > { %p675_p0 = pneg %p674_p1 }
 0x2fa   : > { %p680_p10 = pnand %p679_p6, %p675_p0 }
 0x2fc   : > { %683 = shalt.err (!%p680_p10)
}
 0x2fd   : > { %s730_s26 = smov 256   ;;  %s731_s27 = smov 16  }
 0x2fe   : > { %576 = dma.vmem_to_hbm [thread:$0]  (%p967_p11), %s906_s28, 1024, %s911_s10, %s445_s16, %s730_s26, %s730_s26, %s731_s27  }
 0x2ff PF: > { %p587_p12 = scmp.ge.s32.totalorder %s722_s15, 2  ;;  %s473_s29 = sand.u32 1, %s710_s12  }
 0x300   : > { %p968_p4 = scmp.ne.s32.totalorder %s964_s25, 0  ;;  %s474_s30 = scalar_lea.sflag [#allocation4], %s473_s29 }
 0x302   : > { %p583_p5 = pnand %p587_p12, %p968_p4 }
 0x304   : > { %p584_p7 = pneg %p583_p5 }
 0x306   : > { %705 = dma.done.wait (%p584_p7), %s474_s30, 1024  }
 0x307   : > { %707 = vsyncadd (%p584_p7), %s474_s30, 4294966272  ;;  %p16_p8 = scmp.ge.s32.totalorder %s777_s18, 6   ;;  %s969_s12 = smov %s714_s13 }
 0x308   : > { %s970_s13 = smov %s718_s14  ;;  %s971_s14 = smov %s789_s21 }
 0x309   : > { %s972_s15 = smov %s777_s18  ;;  %18 = sbr.rel (!%p16_p8) target bundleno = 5 (0x5), region = 77 }
 0x30e   :  { %479 = vsyncpa [#allocation3], 1 }
 0x30f   :  { %481 = vsyncpa [#allocation3 + $0x1], 1 }
 0x310   :  { %482 = vsyncpa [#allocation4], 1 }
 0x311   :  { %484 = vsyncpa [#allocation4 + $0x1], 1 }

</bundles_post_ra>
